<compile_context>
chip_gen: v6e
topology: v6e:2x2x1
jax: 0.10.0
libtpu: 0.0.40
codegen_flags: <defaults>
</compile_context>

<pallas_src>
import functools

import jax
import jax.numpy as jnp
from jax import lax
from jax.experimental import pallas as pl
from jax.experimental.pallas import tpu as pltpu

IN_FEATURES = 44
HIDDEN = 64
BN_EPS = 1e-5

QP = 128     # padded head/output lanes (Q -> 128) => unmasked, lane-dense stores


def _round_up(a, b):
    return (a + b - 1) // b * b


def _nndropout_kernel(x_ref, w1_ref, wq_ref, bq_ref, out_ref,
                      sum_ref, sumsq_ref, wcomb_ref, badj_ref, *, batch):
    phase = pl.program_id(0)   # 0: accumulate batch statistics, 1: fold + heads
    t = pl.program_id(1)       # batch-tile index

    @pl.when((phase == 0) & (t == 0))
    def _init():
        sum_ref[...] = jnp.zeros_like(sum_ref)
        sumsq_ref[...] = jnp.zeros_like(sumsq_ref)

    @pl.when(phase == 0)
    def _accumulate():
        # Hidden pre-activation for this tile.  The Linear bias b1 is intentionally
        # dropped: it cancels exactly in (z - mean(z)) and variance is shift-invariant.
        # Invariant relied on: zero-padded batch rows (x row == 0, no bias) give
        # z == 0 and therefore contribute nothing to sum / sumsq.
        z = jnp.dot(x_ref[...], w1_ref[...], preferred_element_type=jnp.float32)
        sum_ref[...] += jnp.sum(z, axis=0, keepdims=True)
        sumsq_ref[...] += jnp.sum(z * z, axis=0, keepdims=True)

    @pl.when((phase == 1) & (t == 0))
    def _fold():
        # One-time fold of the batch statistics into the stacked head weights so the
        # per-tile work in phase 1 is a single matmul.
        inv_n = 1.0 / float(batch)
        mean = sum_ref[...] * inv_n
        # Biased variance == torch training-mode BN.  Sums are f32-accumulated; the
        # E[z^2] - mean^2 form is acceptable here (documented tolerance for bf16).
        var = sumsq_ref[...] * inv_n - mean * mean
        invstd = lax.rsqrt(var + BN_EPS)                       # [1, HIDDEN]
        w1_f = w1_ref[...].astype(jnp.float32) * invstd        # scale hidden columns
        wq_f = wq_ref[...].astype(jnp.float32)
        wcomb_ref[...] = jnp.dot(w1_f, wq_f,
                                 preferred_element_type=jnp.float32
                                 ).astype(wcomb_ref.dtype)
        badj_ref[...] = bq_ref[...] - jnp.dot(mean * invstd, wq_f,
                                              preferred_element_type=jnp.float32)

    @pl.when(phase == 1)
    def _emit():
        out_ref[...] = (jnp.dot(x_ref[...], wcomb_ref[...],
                                preferred_element_type=jnp.float32)
                        + badj_ref[...]).astype(out_ref.dtype)


@functools.partial(jax.jit, static_argnames=("num_quantiles", "operand_dtype"))
def nndropout_forward(x, w1, b1, gamma, beta, wq, bq, *, num_quantiles,
                      operand_dtype=jnp.float32):
    """x: [B, 44] -> [B, num_quantiles] (the Q Linear(64->1) heads, stacked)."""
    del b1  # cancels in (z - mean(z)); see kernel comment
    B = x.shape[0]
    Q = num_quantiles
    assert Q <= QP, "more than 128 quantile heads would need a second output tile"

    # Fold BatchNorm affine into the stacked head weights (free at trace time):
    #   ((zhat * gamma + beta) @ wq + bq) == zhat @ (gamma.T * wq) + (beta @ wq + bq)
    wq_fold = wq * gamma.reshape(HIDDEN, 1)
    bq_fold = beta @ wq + bq

    # Lane-dense heads/output (Q -> 128 zero-padded columns).
    wq_pad = jnp.zeros((HIDDEN, QP), operand_dtype).at[:, :Q].set(
        wq_fold.astype(operand_dtype))
    bq_pad = jnp.zeros((1, QP), jnp.float32).at[:, :Q].set(bq_fold)
    w1_op = w1.astype(operand_dtype)

    # Batch tiling: large tiles (<=2048 rows) to amortize the ~0.35 us per-grid-step
    # overhead; even double-buffered this stays far below the default scoped VMEM.
    row_align = 16 if operand_dtype == jnp.bfloat16 else 8
    tile_b = min(2048, _round_up(B, row_align))
    Bp = _round_up(B, tile_b)
    nt = Bp // tile_b
    # No K padding: x is fed at its native 44-wide layout.  Batch rows are only
    # padded (with zeros) when B is not a multiple of the tile.
    if Bp != B:
        x_in = jnp.zeros((Bp, IN_FEATURES), operand_dtype).at[:B, :].set(
            x.astype(operand_dtype))
    else:
        x_in = x.astype(operand_dtype)

    dt_size = jnp.dtype(operand_dtype).itemsize
    cost = pl.CostEstimate(
        flops=2 * Bp * IN_FEATURES * (HIDDEN + QP),
        transcendentals=HIDDEN,
        bytes_accessed=(2 * Bp * IN_FEATURES * dt_size          # x streamed twice
                        + Bp * QP * 4                           # padded f32 output
                        + (IN_FEATURES * HIDDEN + HIDDEN * QP) * dt_size))

    kernel = functools.partial(_nndropout_kernel, batch=B)
    out = pl.pallas_call(
        kernel,
        out_shape=jax.ShapeDtypeStruct((Bp, QP), jnp.float32),
        grid_spec=pltpu.PrefetchScalarGridSpec(
            num_scalar_prefetch=0,
            grid=(2, nt),                                        # (phase, batch tile)
            in_specs=[
                pl.BlockSpec((tile_b, IN_FEATURES), lambda p, t: (t, 0)),   # x tiles
                pl.BlockSpec((IN_FEATURES, HIDDEN), lambda p, t: (0, 0)),   # w1
                pl.BlockSpec((HIDDEN, QP), lambda p, t: (0, 0)),            # folded heads
                pl.BlockSpec((1, QP), lambda p, t: (0, 0)),                 # folded bias
            ],
            # (t * p, 0): all phase-0 iterations park on block 0 (the block is never
            # written in phase 0, and it is not flushed until phase 1 has written it,
            # because the revisit index only changes after the phase-1/t=0 write).
            # Phase 1 then writes each batch tile exactly once.
            out_specs=pl.BlockSpec((tile_b, QP), lambda p, t: (t * p, 0)),
            scratch_shapes=[pltpu.VMEM((1, HIDDEN), jnp.float32),       # sum(z)
                            pltpu.VMEM((1, HIDDEN), jnp.float32),       # sum(z^2)
                            pltpu.VMEM((IN_FEATURES, QP), operand_dtype),  # W_comb
                            pltpu.VMEM((1, QP), jnp.float32)],          # b_adj
        ),
        compiler_params=pltpu.CompilerParams(
            dimension_semantics=("arbitrary", "arbitrary")),
        cost_estimate=cost,
    )(x_in, w1_op, wq_pad, bq_pad)

    # Single slice back to the real batch / real number of heads.
    return out[:B, :Q]


def init_params(key, num_quantiles):
    """Deterministic synthetic parameters with the same shapes as the PyTorch module."""
    k1, k2, k3, k4, k5, k6 = jax.random.split(key, 6)
    # nn.Linear(44, 64): torch weight is [64, 44]; stored transposed [44, 64] here.
    w1 = jax.random.normal(k1, (IN_FEATURES, HIDDEN), jnp.float32) * 0.1
    b1 = jax.random.normal(k2, (1, HIDDEN), jnp.float32) * 0.1
    # nn.BatchNorm1d(64) affine params (non-trivial values to exercise the folding).
    gamma = 1.0 + 0.05 * jax.random.normal(k3, (1, HIDDEN), jnp.float32)
    beta = 0.05 * jax.random.normal(k4, (1, HIDDEN), jnp.float32)
    # Q x nn.Linear(64, 1): stacked as [64, Q] weight and [1, Q] bias.
    wq = jax.random.normal(k5, (HIDDEN, num_quantiles), jnp.float32) * 0.1
    bq = jax.random.normal(k6, (1, num_quantiles), jnp.float32) * 0.1
    return w1, b1, gamma, beta, wq, bq


def reference_forward(x, w1, b1, gamma, beta, wq, bq, num_quantiles):
    """Pure-JAX reference with the original (unfolded) formulation."""
    z = x @ w1 + b1
    mean = jnp.mean(z, axis=0, keepdims=True)
    var = jnp.mean((z - mean) ** 2, axis=0, keepdims=True)
    z_bn = (z - mean) * lax.rsqrt(var + BN_EPS) * gamma + beta
    out = z_bn @ wq + bq
    return [out[:, i:i + 1] for i in range(num_quantiles)]


if __name__ == "__main__":
    quantiles = (0.1, 0.5, 0.9)
    num_quantiles = len(quantiles)
    batch = 8

    key = jax.random.PRNGKey(0)
    kx, kp = jax.random.split(key)
    x = jax.random.normal(kx, (batch, IN_FEATURES), jnp.float32)
    params = init_params(kp, num_quantiles)
    refs = reference_forward(x, *params, num_quantiles=num_quantiles)

    # f32 path (default): tight tolerance vs. the unfolded reference.
    out = nndropout_forward(x, *params, num_quantiles=num_quantiles)
    out = jax.block_until_ready(out)
    assert out.shape == (batch, num_quantiles)
    outs = [out[:, i:i + 1] for i in range(num_quantiles)]  # list-of-[B,1] like the module
    for o, r in zip(outs, refs):
        assert o.shape == (batch, 1)
        assert jnp.allclose(o, r, atol=1e-4, rtol=1e-4)

    # bf16 operand path (v6e/v7x default candidate): loose smoke tolerance — operands
    # are bf16 but accumulation / BN statistics remain f32 inside the kernel.
    out_bf16 = nndropout_forward(x, *params, num_quantiles=num_quantiles,
                                 operand_dtype=jnp.bfloat16)
    out_bf16 = jax.block_until_ready(out_bf16)
    assert out_bf16.shape == (batch, num_quantiles)
    for i, r in enumerate(refs):
        assert jnp.allclose(out_bf16[:, i:i + 1], r, atol=1.5e-1, rtol=1.5e-1)

    print("KERNEL_OK")
</pallas_src>

<mosaic_0001>
module attributes {stable_mosaic.version = 11 : i64} {
  func.func @_nndropout_kernel(%arg0: i32, %arg1: i32, %arg2: memref<8x44xf32, #tpu.memory_space<vmem>>, %arg3: memref<44x64xf32, #tpu.memory_space<vmem>>, %arg4: memref<64x128xf32, #tpu.memory_space<vmem>>, %arg5: memref<1x128xf32, #tpu.memory_space<vmem>>, %arg6: memref<8x128xf32, #tpu.memory_space<vmem>>, %arg7: memref<1x64xf32, #tpu.memory_space<vmem>>, %arg8: memref<1x64xf32, #tpu.memory_space<vmem>>, %arg9: memref<44x128xf32, #tpu.memory_space<vmem>>, %arg10: memref<1x128xf32, #tpu.memory_space<vmem>>) attributes {dimension_semantics = [#tpu.dimension_semantics<arbitrary>, #tpu.dimension_semantics<arbitrary>], iteration_bounds = array<i64: 2, 1>, scalar_prefetch = 0 : i64, scratch_operands = 4 : i64, tpu.core_type = #tpu.core_type<tc>, window_params = [{transform_indices = @transform_0, window_bounds = array<i64: 8, 44>}, {pipeline_mode = #tpu.pipeline_mode<synchronous>, transform_indices = @transform_1, window_bounds = array<i64: 44, 64>}, {pipeline_mode = #tpu.pipeline_mode<synchronous>, transform_indices = @transform_2, window_bounds = array<i64: 64, 128>}, {pipeline_mode = #tpu.pipeline_mode<synchronous>, transform_indices = @transform_3, window_bounds = array<i64: 1, 128>}, {transform_indices = @transform_4, window_bounds = array<i64: 8, 128>}]} {
    %c0_i32 = arith.constant 0 : i32
    %0 = arith.cmpi eq, %arg0, %c0_i32 : i32
    %c0_i32_0 = arith.constant 0 : i32
    %1 = arith.cmpi eq, %arg1, %c0_i32_0 : i32
    %2 = arith.andi %0, %1 : i1
    %3 = arith.extui %2 : i1 to i32
    %c0_i32_1 = arith.constant 0 : i32
    %4 = arith.cmpi ne, %3, %c0_i32_1 : i32
    scf.if %4 {
      %cst = arith.constant 0.000000e+00 : f32
      %16 = vector.broadcast %cst : f32 to vector<1x64xf32>
      %c0 = arith.constant 0 : index
      %c0_8 = arith.constant 0 : index
      %17 = vector.load %arg7[%c0, %c0_8] : memref<1x64xf32, #tpu.memory_space<vmem>>, vector<1x64xf32>
      tpu.vector_store %arg7[%c0, %c0_8], %16 {strides = array<i32>} : memref<1x64xf32, #tpu.memory_space<vmem>>, vector<1x64xf32>,
      %cst_9 = arith.constant 0.000000e+00 : f32
      %18 = vector.broadcast %cst_9 : f32 to vector<1x64xf32>
      %c0_10 = arith.constant 0 : index
      %c0_11 = arith.constant 0 : index
      %19 = vector.load %arg8[%c0_10, %c0_11] : memref<1x64xf32, #tpu.memory_space<vmem>>, vector<1x64xf32>
      tpu.vector_store %arg8[%c0_10, %c0_11], %18 {strides = array<i32>} : memref<1x64xf32, #tpu.memory_space<vmem>>, vector<1x64xf32>,
    } else {
    }
    %c0_i32_2 = arith.constant 0 : i32
    %5 = arith.cmpi eq, %arg0, %c0_i32_2 : i32
    %6 = arith.extui %5 : i1 to i32
    %c0_i32_3 = arith.constant 0 : i32
    %7 = arith.cmpi ne, %6, %c0_i32_3 : i32
    scf.if %7 {
      %c0 = arith.constant 0 : index
      %c0_8 = arith.constant 0 : index
      %16 = vector.load %arg2[%c0, %c0_8] : memref<8x44xf32, #tpu.memory_space<vmem>>, vector<8x44xf32>
      %c0_9 = arith.constant 0 : index
      %c0_10 = arith.constant 0 : index
      %17 = vector.load %arg3[%c0_9, %c0_10] : memref<44x64xf32, #tpu.memory_space<vmem>>, vector<44x64xf32>
      %cst = arith.constant dense<0.000000e+00> : vector<8x64xf32>
      %18 = tpu.matmul %16, %17, %cst {dimension_numbers = #tpu.dot_dimension_numbers<[1], [0], [0], [1], [0, 0, 1, 1], [], []>} : vector<8x44xf32>, vector<44x64xf32>, vector<8x64xf32> -> vector<8x64xf32>
      %c0_11 = arith.constant 0 : index
      %c0_12 = arith.constant 0 : index
      %19 = vector.load %arg7[%c0_11, %c0_12] : memref<1x64xf32, #tpu.memory_space<vmem>>, vector<1x64xf32>
      %cst_13 = arith.constant dense<0.000000e+00> : vector<64xf32>
      %20 = vector.multi_reduction <add>, %18, %cst_13 [0] : vector<8x64xf32> to vector<64xf32>
      %21 = vector.shape_cast %20 : vector<64xf32> to vector<1x64xf32>
      %22 = arith.addf %19, %21 : vector<1x64xf32>
      %c0_14 = arith.constant 0 : index
      %c0_15 = arith.constant 0 : index
      %23 = vector.load %arg7[%c0_14, %c0_15] : memref<1x64xf32, #tpu.memory_space<vmem>>, vector<1x64xf32>
      tpu.vector_store %arg7[%c0_14, %c0_15], %22 {strides = array<i32>} : memref<1x64xf32, #tpu.memory_space<vmem>>, vector<1x64xf32>,
      %c0_16 = arith.constant 0 : index
      %c0_17 = arith.constant 0 : index
      %24 = vector.load %arg8[%c0_16, %c0_17] : memref<1x64xf32, #tpu.memory_space<vmem>>, vector<1x64xf32>
      %25 = arith.mulf %18, %18 : vector<8x64xf32>
      %cst_18 = arith.constant dense<0.000000e+00> : vector<64xf32>
      %26 = vector.multi_reduction <add>, %25, %cst_18 [0] : vector<8x64xf32> to vector<64xf32>
      %27 = vector.shape_cast %26 : vector<64xf32> to vector<1x64xf32>
      %28 = arith.addf %24, %27 : vector<1x64xf32>
      %c0_19 = arith.constant 0 : index
      %c0_20 = arith.constant 0 : index
      %29 = vector.load %arg8[%c0_19, %c0_20] : memref<1x64xf32, #tpu.memory_space<vmem>>, vector<1x64xf32>
      tpu.vector_store %arg8[%c0_19, %c0_20], %28 {strides = array<i32>} : memref<1x64xf32, #tpu.memory_space<vmem>>, vector<1x64xf32>,
    } else {
    }
    %c1_i32 = arith.constant 1 : i32
    %8 = arith.cmpi eq, %arg0, %c1_i32 : i32
    %c0_i32_4 = arith.constant 0 : i32
    %9 = arith.cmpi eq, %arg1, %c0_i32_4 : i32
    %10 = arith.andi %8, %9 : i1
    %11 = arith.extui %10 : i1 to i32
    %c0_i32_5 = arith.constant 0 : i32
    %12 = arith.cmpi ne, %11, %c0_i32_5 : i32
    scf.if %12 {
      %c0 = arith.constant 0 : index
      %c0_8 = arith.constant 0 : index
      %16 = vector.load %arg7[%c0, %c0_8] : memref<1x64xf32, #tpu.memory_space<vmem>>, vector<1x64xf32>
      %cst = arith.constant 1.250000e-01 : f32
      %17 = vector.broadcast %cst : f32 to vector<1x64xf32>
      %18 = arith.mulf %16, %17 : vector<1x64xf32>
      %c0_9 = arith.constant 0 : index
      %c0_10 = arith.constant 0 : index
      %19 = vector.load %arg8[%c0_9, %c0_10] : memref<1x64xf32, #tpu.memory_space<vmem>>, vector<1x64xf32>
      %cst_11 = arith.constant 1.250000e-01 : f32
      %20 = vector.broadcast %cst_11 : f32 to vector<1x64xf32>
      %21 = arith.mulf %19, %20 : vector<1x64xf32>
      %22 = arith.mulf %18, %18 : vector<1x64xf32>
      %23 = arith.subf %21, %22 : vector<1x64xf32>
      %cst_12 = arith.constant 9.99999974E-6 : f32
      %24 = vector.broadcast %cst_12 : f32 to vector<1x64xf32>
      %25 = arith.addf %23, %24 : vector<1x64xf32>
      %26 = math.rsqrt %25 : vector<1x64xf32>
      %c0_13 = arith.constant 0 : index
      %c0_14 = arith.constant 0 : index
      %27 = vector.load %arg3[%c0_13, %c0_14] : memref<44x64xf32, #tpu.memory_space<vmem>>, vector<44x64xf32>
      %28 = vector.broadcast %26 : vector<1x64xf32> to vector<44x64xf32>
      %29 = arith.mulf %27, %28 : vector<44x64xf32>
      %c0_15 = arith.constant 0 : index
      %c0_16 = arith.constant 0 : index
      %30 = vector.load %arg4[%c0_15, %c0_16] : memref<64x128xf32, #tpu.memory_space<vmem>>, vector<64x128xf32>
      %cst_17 = arith.constant dense<0.000000e+00> : vector<44x128xf32>
      %31 = tpu.matmul %29, %30, %cst_17 {dimension_numbers = #tpu.dot_dimension_numbers<[1], [0], [0], [1], [0, 0, 1, 1], [], []>} : vector<44x64xf32>, vector<64x128xf32>, vector<44x128xf32> -> vector<44x128xf32>
      %c0_18 = arith.constant 0 : index
      %c0_19 = arith.constant 0 : index
      %32 = vector.load %arg9[%c0_18, %c0_19] : memref<44x128xf32, #tpu.memory_space<vmem>>, vector<44x128xf32>
      tpu.vector_store %arg9[%c0_18, %c0_19], %31 {strides = array<i32>} : memref<44x128xf32, #tpu.memory_space<vmem>>, vector<44x128xf32>,
      %c0_20 = arith.constant 0 : index
      %c0_21 = arith.constant 0 : index
      %33 = vector.load %arg5[%c0_20, %c0_21] : memref<1x128xf32, #tpu.memory_space<vmem>>, vector<1x128xf32>
      %34 = arith.mulf %18, %26 : vector<1x64xf32>
      %cst_22 = arith.constant dense<0.000000e+00> : vector<1x128xf32>
      %35 = tpu.matmul %34, %30, %cst_22 {dimension_numbers = #tpu.dot_dimension_numbers<[1], [0], [0], [1], [0, 0, 1, 1], [], []>} : vector<1x64xf32>, vector<64x128xf32>, vector<1x128xf32> -> vector<1x128xf32>
      %36 = arith.subf %33, %35 : vector<1x128xf32>
      %c0_23 = arith.constant 0 : index
      %c0_24 = arith.constant 0 : index
      %37 = vector.load %arg10[%c0_23, %c0_24] : memref<1x128xf32, #tpu.memory_space<vmem>>, vector<1x128xf32>
      tpu.vector_store %arg10[%c0_23, %c0_24], %36 {strides = array<i32>} : memref<1x128xf32, #tpu.memory_space<vmem>>, vector<1x128xf32>,
    } else {
    }
    %c1_i32_6 = arith.constant 1 : i32
    %13 = arith.cmpi eq, %arg0, %c1_i32_6 : i32
    %14 = arith.extui %13 : i1 to i32
    %c0_i32_7 = arith.constant 0 : i32
    %15 = arith.cmpi ne, %14, %c0_i32_7 : i32
    scf.if %15 {
      %c0 = arith.constant 0 : index
      %c0_8 = arith.constant 0 : index
      %16 = vector.load %arg2[%c0, %c0_8] : memref<8x44xf32, #tpu.memory_space<vmem>>, vector<8x44xf32>
      %c0_9 = arith.constant 0 : index
      %c0_10 = arith.constant 0 : index
      %17 = vector.load %arg9[%c0_9, %c0_10] : memref<44x128xf32, #tpu.memory_space<vmem>>, vector<44x128xf32>
      %cst = arith.constant dense<0.000000e+00> : vector<8x128xf32>
      %18 = tpu.matmul %16, %17, %cst {dimension_numbers = #tpu.dot_dimension_numbers<[1], [0], [0], [1], [0, 0, 1, 1], [], []>} : vector<8x44xf32>, vector<44x128xf32>, vector<8x128xf32> -> vector<8x128xf32>
      %c0_11 = arith.constant 0 : index
      %c0_12 = arith.constant 0 : index
      %19 = vector.load %arg10[%c0_11, %c0_12] : memref<1x128xf32, #tpu.memory_space<vmem>>, vector<1x128xf32>
      %20 = vector.broadcast %19 : vector<1x128xf32> to vector<8x128xf32>
      %21 = arith.addf %18, %20 : vector<8x128xf32>
      %c0_13 = arith.constant 0 : index
      %c0_14 = arith.constant 0 : index
      %22 = vector.load %arg6[%c0_13, %c0_14] : memref<8x128xf32, #tpu.memory_space<vmem>>, vector<8x128xf32>
      tpu.vector_store %arg6[%c0_13, %c0_14], %21 {strides = array<i32>} : memref<8x128xf32, #tpu.memory_space<vmem>>, vector<8x128xf32>,
    } else {
    }
    return
  }
  func.func @transform_0(%arg0: i32, %arg1: i32) -> (i32, i32) {
    %c0_i32 = arith.constant 0 : i32
    %c0_i32_0 = arith.constant 0 : i32
    return %arg1, %c0_i32 : i32, i32
  }
  func.func @transform_1(%arg0: i32, %arg1: i32) -> (i32, i32) {
    %c0_i32 = arith.constant 0 : i32
    %c0_i32_0 = arith.constant 0 : i32
    %c0_i32_1 = arith.constant 0 : i32
    return %c0_i32, %c0_i32_0 : i32, i32
  }
  func.func @transform_2(%arg0: i32, %arg1: i32) -> (i32, i32) {
    %c0_i32 = arith.constant 0 : i32
    %c0_i32_0 = arith.constant 0 : i32
    %c0_i32_1 = arith.constant 0 : i32
    return %c0_i32, %c0_i32_0 : i32, i32
  }
  func.func @transform_3(%arg0: i32, %arg1: i32) -> (i32, i32) {
    %c0_i32 = arith.constant 0 : i32
    %c0_i32_0 = arith.constant 0 : i32
    %c0_i32_1 = arith.constant 0 : i32
    return %c0_i32, %c0_i32_0 : i32, i32
  }
  func.func @transform_4(%arg0: i32, %arg1: i32) -> (i32, i32) {
    %0 = arith.muli %arg1, %arg0 : i32
    %c0_i32 = arith.constant 0 : i32
    %c0_i32_0 = arith.constant 0 : i32
    return %0, %c0_i32 : i32, i32
  }
}

</mosaic_0001>

<bundles_post_ra>
// kernel: nndropout_forward.1
= control target key start
LH: loop header
LB: loop body
LE: loop exit
PB: predicated region body
PF: predicated region fallthrough
CT: control target
= control target key end

     0   :  { %s957_s15 = smov 0   ;;  %s959_s16 = smov 0   ;;  %s1069_s0 = inlined_call_operand.vmem [shape: f32[8,44], index: 0, kind: input, shape index: {}]   ;;  %s1070_s1 = inlined_call_operand.vmem [shape: f32[44,64], index: 1, kind: input, shape index: {}]   ;;  %s1071_s2 = inlined_call_operand.vmem [shape: f32[64,128], index: 2, kind: input, shape index: {}]   ;;  %s1072_s3 = inlined_call_operand.vmem [shape: f32[1,128], index: 3, kind: input, shape index: {}]   ;;  %s1073_s4 = inlined_call_operand.vmem [shape: f32[8,128], index: 4, kind: output, shape index: {}]  }
   0x1   :  { %s961_s17 = smov 0  }
   0x2 LB: > { %s26_s18 = sadd.s32 1, %s919_s16  ;;  %p734_p0 = scmp.ge.s32.totalorder %s923_s17, 1  ;;  %s923_s17 = sphi %s961_s17, %s14_s17   ;;  %s919_s16 = sphi %s959_s16, %s1075_s16   ;;  %s915_s15 = sphi %s957_s15, %s1074_s15  }
   0x3   : > { %p28_p1 = scmp.ge.s32.totalorder %s26_s18, 2  ;;  %p175_p2 = scmp.lt.s32.totalorder %s923_s17, 3 }
   0x5   : > { %s1077_s18 = smov (%p28_p1, %s26_s18), 0  ;;  %p176_p3 = pnand %p734_p0, %p175_p2 }
   0x6   : > { %p210_p4 = scmp.eq.s32.totalorder (!%p176_p3), %s915_s15, 0 }
   0x7   : > { %179 = sbr.rel (%p176_p3) target bundleno = 700 (0x2bc), region = 36 }
   0xc   : > { %215 = sbr.rel (!%p210_p4) target bundleno = 17 (0x11), region = 40  ;;  %vm216_vm0 = vcmask (%p210_p4), 516096   ;;  %v925_v0 = vmov (%p210_p4), 0.0  }
   0xd   : > { %217 = vst.msk [vmem:[#allocation2] sm:$0x1] (%p210_p4), %vm216_vm0, %v925_v0  ;;  %218 = vst.msk [vmem:[#allocation3] sm:$0x1] (%p210_p4), %vm216_vm0, %v925_v0 }
  0x11 PF: > { %p736_p5 = scmp.ne.s32.totalorder %s915_s15, 0 }
  0x13   : > { %221 = sbr.rel (%p736_p5) target bundleno = 248 (0xf8), region = 44 }
  0x18   : > { %v228_v1 = vld [vmem:[%s1070_s1 + $0x28] sm:$0xf]  ;;  %vm233_vm1 = vcmask 1043456   ;;  %v926_v2 = vmov 0.0   ;;  %v227_v3 = vld [vmem:[%s1070_s1 + $0x20] sm:$0xff]  ;;  %vm927_vm2 = vmmov 0  }
  0x19   : > { %794 = vmatprep.subr.mxu0 %v926_v2  ;;  %806 = vmatprep.mubr.msk.f32.mxu0 %vm927_vm2, %v926_v2  ;;  %v226_v4 = vld [vmem:[%s1070_s1 + $0x18] sm:$0xff]  ;;  %v225_v5 = vld [vmem:[%s1070_s1 + $0x10] sm:$0xff]  ;;  %v224_v6 = vld [vmem:[%s1070_s1 + $0x8] sm:$0xff]  ;;  %vm229_vm3 = vcmask 359424   ;;  %vm308_vm4 = vcmask 523264   ;;  %vm317_vm5 = vcmask 516096  }
  0x1a   : > { %795 = vmatpush3.msk.msra.mxu0 %vm233_vm1, %v228_v1  ;;  %v223_v7 = vld [vmem:[%s1070_s1] sm:$0xff] }
  0x1b   : > { %796 = vmatprep.subr.mxu0 %v926_v2  ;;  %v222_v8 = vld [vmem:[%s1069_s0] sm:$0xff] }
  0x1c   : > { %797 = vmatpush3.msra.mxu0 %v227_v3  ;;  %v307_v23 = vld [vmem:[#allocation2] sm:$0x1]  ;;  %v319_v26 = vld [vmem:[#allocation3] sm:$0x1] }
  0x1d   : > { %798 = vmatprep.subr.mxu0 %v926_v2 }
  0x1e   : > { %799 = vmatpush3.msra.mxu0 %v226_v4 }
  0x1f   : > { %800 = vmatprep.subr.mxu0 %v926_v2 }
  0x20   : > { %801 = vmatpush3.msra.mxu0 %v225_v5 }
  0x21   : > { %802 = vmatprep.subr.mxu0 %v926_v2 }
  0x22   : > { %803 = vmatpush3.msra.mxu0 %v224_v6 }
  0x23   : > { %804 = vmatprep.subr.mxu0 %v926_v2 }
  0x24   : > { %805 = vmatpush3.msra.mxu0 %v223_v7 }
  0x25   : > { %807 = vmatmul.mubr.msk.f32.vlgmr.msra.gmra.mxu0 %vm229_vm3, %v222_v8 }
  0xe5   : > { %v303_v9 = vpop.f32.mrf.mxu0 }
  0xe6   : > { %v309_v10 = vsel %vm308_vm4, %v303_v9, 0.0  ;;  %v320_v11 = vmul.f32 %v303_v9, %v303_v9 }
  0xe7   : > { %v310_v12 = vrot.slane %v309_v10, 4  ;;  %v808_v13 = vpop.f32.mrf.mxu0 }
  0xe8   : > { %v321_v14 = vsel %vm308_vm4, %v320_v11, 0.0 }
  0xe9   : > { %v311_v15 = vadd.f32 %v310_v12, %v309_v10  ;;  %v322_v16 = vrot.slane %v321_v14, 4 }
  0xeb   : > { %v312_v17 = vrot.slane %v311_v15, 2  ;;  %v323_v18 = vadd.f32 %v322_v16, %v321_v14 }
  0xed   : > { %v313_v19 = vadd.f32 %v312_v17, %v311_v15  ;;  %v324_v20 = vrot.slane %v323_v18, 2 }
  0xef   : > { %v314_v21 = vrot.slane %v313_v19, 1  ;;  %v325_v22 = vadd.f32 %v324_v20, %v323_v18 }
  0xf1   : > { %v315_v24 = vadd.f32 %v314_v21, %v313_v19  ;;  %v326_v25 = vrot.slane %v325_v22, 1 }
  0xf3   : > { %v316_v27 = vadd.f32 %v315_v24, %v307_v23  ;;  %v327_v28 = vadd.f32 %v326_v25, %v325_v22 }
  0xf5   : > { %318 = vst.msk [vmem:[#allocation2] sm:$0x1] %vm317_vm5, %v316_v27  ;;  %v328_v29 = vadd.f32 %v327_v28, %v319_v26 }
  0xf7   : > { %329 = vst.msk [vmem:[#allocation3] sm:$0x1] %vm317_vm5, %v328_v29 }
  0xf8 PF: > { %p330_p6 = scmp.eq.s32.totalorder %s915_s15, 1 }
  0xf9   : > { %v368_v30 = vld [vmem:[%s1071_s2 + $0x38] sm:$0xff] (%p330_p6)  ;;  %v367_v31 = vld [vmem:[%s1071_s2 + $0x30] sm:$0xff] (%p330_p6)  ;;  %v928_v32 = vmov (%p330_p6), 0.0   ;;  %v366_v33 = vld [vmem:[%s1071_s2 + $0x28] sm:$0xff] (%p330_p6)  ;;  %v350_v46 = vlaneseq (%p330_p6)  ;;  %vm929_vm6 = vmmov (%p330_p6), 0   ;;  %vm369_vm7 = vcmask (%p330_p6), 523264  }
  0xfa   : > { %334 = sbr.rel (!%p330_p6) target bundleno = 484 (0x1e4), region = 48  ;;  %809 = vmatprep.subr.mxu0 (%p330_p6), %v368_v30  ;;  %834 = vmatprep.subr.mxu1 (%p330_p6), %v928_v32  ;;  %v365_v37 = vld [vmem:[%s1071_s2 + $0x20] sm:$0xff] (%p330_p6)  ;;  %v364_v40 = vld [vmem:[%s1071_s2 + $0x18] sm:$0xff] (%p330_p6)  ;;  %v363_v42 = vld [vmem:[%s1071_s2 + $0x10] sm:$0xff] (%p330_p6) }
  0xfb   : > { %810 = vmatpush3.msra.mxu0 (%p330_p6), %v368_v30  ;;  %835 = vmatpush3.msra.mxu1 (%p330_p6), %v368_v30  ;;  %v362_v44 = vld [vmem:[%s1071_s2 + $0x8] sm:$0xff] (%p330_p6)  ;;  %v361_v45 = vld [vmem:[%s1071_s2] sm:$0xff] (%p330_p6)  ;;  %v351_v47 = vshrl.u32 (%p330_p6), %v350_v46, 7  ;;  %v345_v52 = vld [vmem:[%s1070_s1 + $0x10] sm:$0xff] (%p330_p6) }
  0xfc   : > { %v335_v34 = vld [vmem:[#allocation2] sm:$0x1] (%p330_p6)  ;;  %811 = vmatprep.subr.mxu0 (%p330_p6), %v367_v31  ;;  %836 = vmatprep.subr.mxu1 (%p330_p6), %v928_v32  ;;  %v344_v51 = vld [vmem:[%s1070_s1 + $0x8] sm:$0xff] (%p330_p6)  ;;  %v346_v58 = vld [vmem:[%s1070_s1 + $0x18] sm:$0xff] (%p330_p6) }
  0xfd   : > { %v336_v35 = vmul.f32 (%p330_p6), 0.125, %v335_v34  ;;  %812 = vmatpush3.msra.mxu0 (%p330_p6), %v367_v31  ;;  %837 = vmatpush3.msra.mxu1 (%p330_p6), %v367_v31  ;;  %v352_v48 = vsub.s32 (%p330_p6), 0, %v351_v47  ;;  %v343_v50 = vld [vmem:[%s1070_s1] sm:$0xff] (%p330_p6)  ;;  %v348_v62 = vld [vmem:[%s1070_s1 + $0x28] sm:$0xf] (%p330_p6) }
  0xfe   : > { %v337_v36 = vld [vmem:[#allocation3] sm:$0x1] (%p330_p6)  ;;  %813 = vmatprep.subr.mxu0 (%p330_p6), %v366_v33  ;;  %838 = vmatprep.subr.mxu1 (%p330_p6), %v928_v32  ;;  %v489_v0 = vld [vmem:[%s1072_s3] sm:$0x1] (%p330_p6) }
  0xff   : > { %v338_v38 = vmul.f32 0.125, %v337_v36  ;;  %v339_v39 = vmul.f32 %v336_v35, %v336_v35  ;;  %814 = vmatpush3.msra.mxu0 %v366_v33  ;;  %839 = vmatpush3.msra.mxu1 %v366_v33  ;;  %v347_v59 = vld [vmem:[%s1070_s1 + $0x20] sm:$0xff] }
 0x100   : > { %815 = vmatprep.subr.mxu0 %v365_v37  ;;  %840 = vmatprep.subr.mxu1 %v928_v32 }
 0x101   : > { %v340_v41 = vsub.f32 %v338_v38, %v339_v39  ;;  %816 = vmatpush3.msra.mxu0 %v365_v37  ;;  %841 = vmatpush3.msra.mxu1 %v365_v37 }
 0x102   : > { %817 = vmatprep.subr.mxu0 %v364_v40  ;;  %842 = vmatprep.subr.mxu1 %v928_v32 }
 0x103   : > { %v341_v43 = vadd.f32 1e-05, %v340_v41  ;;  %818 = vmatpush3.msra.mxu0 %v364_v40  ;;  %843 = vmatpush3.msra.mxu1 %v364_v40 }
 0x104   : > { %819 = vmatprep.subr.mxu0 %v363_v42  ;;  %844 = vmatprep.subr.mxu1 %v928_v32 }
 0x105   : > { %899 = vrsqrt.f32 %v341_v43  ;;  %820 = vmatpush3.msra.mxu0 %v363_v42  ;;  %845 = vmatpush3.msra.mxu1 %v363_v42 }
 0x106   : > { %821 = vmatprep.subr.mxu0 %v362_v44  ;;  %846 = vmatprep.subr.mxu1 %v928_v32 }
 0x107   : > { %822 = vmatpush3.msra.mxu0 %v362_v44  ;;  %847 = vmatpush3.msra.mxu1 %v362_v44 }
 0x108   : > { %823 = vmatprep.subr.mxu0 %v361_v45  ;;  %848 = vmatprep.subr.mxu1 %v928_v32 }
 0x109   : > { %824 = vmatpush3.msra.mxu0 %v361_v45  ;;  %849 = vmatpush3.msra.mxu1 %v361_v45 }
 0x10a   : > { %850 = vmatprep.mubr.msk.f32.mxu1 %vm929_vm6, %v928_v32 }
 0x112   : > { %v900_v49 = vpop.eup %899 }
 0x113   : > { %v353_v53 = vrot.slane %v900_v49, %v352_v48  ;;  %v490_v54 = vmul.f32 %v900_v49, %v336_v35 }
 0x115   : > { %v355_v55 = vmul.f32 %v353_v53, %v343_v50  ;;  %v356_v56 = vmul.f32 %v353_v53, %v344_v51  ;;  %v357_v57 = vmul.f32 %v353_v53, %v345_v52  ;;  %851 = vmatmul.mubr.msk.f32.vlgmr.msra.gmra.mxu1 %vm369_vm7, %v490_v54  ;;  %v358_v60 = vmul.f32 %v353_v53, %v346_v58 }
 0x116   : > { %v359_v61 = vmul.f32 %v353_v53, %v347_v59  ;;  %v360_v63 = vmul.f32 %v353_v53, %v348_v62 }
 0x117   : > { %825 = vmatprep.mubr.msk.f32.mxu0 %vm369_vm7, %v355_v55 }
 0x118   : > { %826 = vmatmul.mubr.msk.f32.vlgmr.msra.gmra.mxu0 %vm369_vm7, %v356_v56 }
 0x119   : > { %828 = vmatprep.mubr.msk.f32.mxu0 %vm369_vm7, %v357_v57 }
 0x11c   : > { %829 = vmatmul.mubr.msk.f32.gmra.mxu0 %vm369_vm7, %v358_v60 }
 0x11d   : > { %831 = vmatprep.mubr.msk.f32.mxu0 %vm369_vm7, %v359_v61 }
 0x120   : > { %832 = vmatmul.mubr.msk.f32.gmra.mxu0 %vm369_vm7, %v360_v63 }
 0x1d5   : > { %v560_v1 = vpop.f32.mrf.mxu1 }
 0x1d6   : > { %v564_v2 = vsub.f32 %v489_v0, %v560_v1 }
 0x1d7   : > { %v852_v3 = vpop.f32.mrf.mxu1 }
 0x1d8   : > { %v827_v4 = vpop.f32.mrf.mxu0  ;;  %565 = vst [vmem:[#allocation5] sm:$0x1] %v564_v2 }
 0x1d9   : > { %484 = vst [vmem:[#allocation4 + $0x10] sm:$0xff] %v827_v4 }
 0x1da   : > { %v454_v5 = vpop.f32.mrf.mxu0 }
 0x1db   : > { %483 = vst [vmem:[#allocation4 + $0x28] sm:$0xff] %v454_v5 }
 0x1dc   : > { %v830_v6 = vpop.f32.mrf.mxu0 }
 0x1dd   : > { %486 = vst [vmem:[#allocation4] sm:$0xff] %v830_v6 }
 0x1de   : > { %v464_v7 = vpop.f32.mrf.mxu0 }
 0x1df   : > { %485 = vst [vmem:[#allocation4 + $0x8] sm:$0xff] %v464_v7 }
 0x1e0   : > { %v833_v8 = vpop.f32.mrf.mxu0 }
 0x1e1   : > { %488 = vst [vmem:[#allocation4 + $0x20] sm:$0xf] %v833_v8 }
 0x1e2   : > { %v474_v9 = vpop.f32.mrf.mxu0 }
 0x1e3   : > { %487 = vst [vmem:[#allocation4 + $0x18] sm:$0xff] %v474_v9 }
 0x1e4 PF: > { %p747_p7 = scmp.ne.s32.totalorder %s915_s15, 1 }
 0x1e6   : > { %568 = sbr.rel (%p747_p7) target bundleno = 700 (0x2bc), region = 52 }
 0x1eb   : > { %v575_v10 = vld [vmem:[#allocation4 + $0x20] sm:$0xf]  ;;  %vm587_vm8 = vcmask 1043456   ;;  %v930_v11 = vmov 0.0   ;;  %v574_v12 = vld [vmem:[#allocation4 + $0x18] sm:$0xff]  ;;  %vm931_vm9 = vmmov 0  }
 0x1ec   : > { %853 = vmatprep.subr.mxu0 %v930_v11  ;;  %865 = vmatprep.mubr.msk.f32.mxu0 %vm931_vm9, %v930_v11  ;;  %v573_v13 = vld [vmem:[#allocation4] sm:$0xff]  ;;  %v572_v14 = vld [vmem:[#allocation4 + $0x8] sm:$0xff]  ;;  %v571_v15 = vld [vmem:[#allocation4 + $0x10] sm:$0xff]  ;;  %vm583_vm10 = vcmask 359424  }
 0x1ed   : > { %854 = vmatpush3.msk.msra.mxu0 %vm587_vm8, %v575_v10  ;;  %v570_v16 = vld [vmem:[#allocation4 + $0x28] sm:$0xff]  ;;  %v569_v17 = vld [vmem:[%s1069_s0] sm:$0xff]  ;;  %v748_v18 = vld [vmem:[#allocation5] ss:$0 sm:$0xff] }
 0x1ee   : > { %855 = vmatprep.subr.mxu0 %v930_v11 }
 0x1ef   : > { %856 = vmatpush3.msra.mxu0 %v574_v12 }
 0x1f0   : > { %857 = vmatprep.subr.mxu0 %v930_v11 }
 0x1f1   : > { %858 = vmatpush3.msra.mxu0 %v573_v13 }
 0x1f2   : > { %859 = vmatprep.subr.mxu0 %v930_v11 }
 0x1f3   : > { %860 = vmatpush3.msra.mxu0 %v572_v14 }
 0x1f4   : > { %861 = vmatprep.subr.mxu0 %v930_v11 }
 0x1f5   : > { %862 = vmatpush3.msra.mxu0 %v571_v15 }
 0x1f6   : > { %863 = vmatprep.subr.mxu0 %v930_v11 }
 0x1f7   : > { %864 = vmatpush3.msra.mxu0 %v570_v16 }
 0x1f8   : > { %866 = vmatmul.mubr.msk.f32.vlgmr.msra.gmra.mxu0 %vm583_vm10, %v569_v17 }
 0x2b8   : > { %v657_v19 = vpop.f32.mrf.mxu0 }
 0x2b9   : > { %v658_v20 = vadd.f32 %v748_v18, %v657_v19 }
 0x2ba   : > { %v867_v21 = vpop.f32.mrf.mxu0 }
 0x2bb   : > { %661 = vst [vmem:[%s1073_s4] sm:$0xff] %v658_v20 }
 0x2bc PF: > { %s14_s17 = sadd.s32 1, %s923_s17   ;;  %s1074_s15 = smov %s919_s16 }
 0x2bd   : > { %p11_p8 = scmp.ge.s32.totalorder %s14_s17, 4   ;;  %s1075_s16 = smov %s1077_s18 }
 0x2bf   :  { %13 = sbr.rel (!%p11_p8) target bundleno = 2 (0x2), region = 82 }

</bundles_post_ra>
